<compile_context>
chip_gen: v6e
topology: v6e:2x2x1
jax: 0.10.0
libtpu: 0.0.40
codegen_flags: <defaults>
</compile_context>

<pallas_src>
import functools
import math
from typing import NamedTuple

import jax
import jax.numpy as jnp
from jax.experimental import pallas as pl
from jax.experimental.pallas import tpu as pltpu

MASK_VALUE = -9.0e15  # same constant the PyTorch module uses


def _round_up(v, m):
    return (v + m - 1) // m * m


def _device_kind():
    try:
        return jax.devices()[0].device_kind.lower()
    except Exception:
        return ""


def _largest_tile(n0, cap, min_blocks=1):
    """Largest multiple of 128 that divides n0, is <= cap, leaves >= min_blocks."""
    best = 128
    t = 128
    top = min(cap, n0)
    while t <= top:
        if n0 % t == 0 and n0 // t >= min_blocks:
            best = t
        t += 128
    return best


def _choose_tiles(n):
    kind = _device_kind()
    # v5e/v6e have 128 MiB VMEM/TC -> allow bigger key tiles; v7x (64 MiB/TC)
    # and unknown chips get a safer cap.
    tk_cap = 2048 if ("v5" in kind or "v6" in kind) else 1024
    n0 = _round_up(max(n, 128), 128)
    tk = _largest_tile(n0, tk_cap, 1)
    # >= 2 row blocks whenever possible so both v7x TensorCores get work.
    tq = _largest_tile(n0, 512, 2 if n0 >= 256 else 1)
    return n0, tq, tk


class PreparedAdjacency(NamedTuple):
    adjp: jax.Array  # [n_p, n_p] int8, zero-padded adjacency
    occ: jax.Array   # [nq * nk] int32 per-(row-block, key-block) occupancy
    n_p: int
    tq: int
    tk: int


def prepare_adjacency(adj, *, tq=None, tk=None):
    """Pad + cast the adjacency to int8 once and build the occupancy table.

    A graph's adjacency is usually static across layers/steps, so do this once
    and pass the result to graph_attention(..., prepared=...) -- it removes an
    O(N^2) pad/cast HBM pass from every forward call.
    """
    n = adj.shape[0]
    n0, tq_d, tk_d = _choose_tiles(n)
    tq = tq_d if tq is None else int(tq)
    tk = tk_d if tk is None else int(tk)
    assert tq % 8 == 0 and tk % 128 == 0, "tq must be a multiple of 8, tk of 128"
    n_p = _round_up(n0, math.lcm(tq, tk))

    adjp = jnp.zeros((n_p, n_p), jnp.int8).at[:n, :n].set((adj > 0).astype(jnp.int8))
    nq, nk = n_p // tq, n_p // tk
    occ = (adjp.astype(jnp.int32).reshape(nq, tq, nk, tk).sum(axis=(1, 3)) > 0)
    occ = occ.astype(jnp.int32)
    # Always process key block 0 so every row block accumulates a nonzero
    # softmax denominator (avoids 0/0 for all-padded / isolated row blocks).
    occ = occ.at[:, 0].set(1)
    return PreparedAdjacency(adjp, occ.reshape(-1), n_p, tq, tk)


# -----------------------------------------------------------------------------
# Stage 1: [h | f1 f2] = x @ [W | W a1 | W a2]   (f32 MXU, bf16 h output)
# -----------------------------------------------------------------------------
def _proj_kernel(x_ref, w_ref, h_ref, f_ref, *, d_p):
    # f32 operands (K = in_features is tiny, so MXU cost is negligible); f32
    # accumulate keeps the f1/f2 attention logits full precision before exp.
    acc = jnp.dot(x_ref[...], w_ref[...], preferred_element_type=jnp.float32)
    h_ref[...] = acc[:, :d_p].astype(h_ref.dtype)  # bf16 h for the PV matmul
    f_ref[...] = acc[:, d_p:]                      # f32 [., 128]; col0=f1, col1=f2


def _project(xp, w_aug, d_p):
    n_p, d_in = xp.shape
    d_aug = w_aug.shape[1]
    tr = _largest_tile(n_p, 1024, 1)
    kernel = functools.partial(_proj_kernel, d_p=d_p)
    return pl.pallas_call(
        kernel,
        out_shape=(jax.ShapeDtypeStruct((n_p, d_p), jnp.bfloat16),
                   jax.ShapeDtypeStruct((n_p, 128), jnp.float32)),
        grid=(n_p // tr,),
        in_specs=[
            pl.BlockSpec((tr, d_in), lambda i: (i, 0)),   # K kept at true d_in
            pl.BlockSpec((d_in, d_aug), lambda i: (0, 0)),
        ],
        out_specs=(
            pl.BlockSpec((tr, d_p), lambda i: (i, 0)),
            pl.BlockSpec((tr, 128), lambda i: (i, 0)),
        ),
        compiler_params=pltpu.CompilerParams(
            dimension_semantics=("parallel",),
            vmem_limit_bytes=32 * 1024 * 1024,
        ),
    )(xp, w_aug)


# -----------------------------------------------------------------------------
# Stage 2: masked online-softmax attention + aggregation, block-sparse skip
# -----------------------------------------------------------------------------
def _gat_attn_kernel(occ_ref, f1_ref, f2_ref, adj_ref, h_ref, o_ref,
                     m_sc, l_sc, acc_sc, *, alpha, concat):
    kv = pl.program_id(1)

    @pl.when(kv == 0)
    def _():
        m_sc[...] = jnp.full_like(m_sc, -jnp.inf)
        l_sc[...] = jnp.zeros_like(l_sc)
        acc_sc[...] = jnp.zeros_like(acc_sc)

    # Block-sparsity skip: an all-zero adj block contributes exactly 0 to the
    # softmax (exp(MASK - m) underflows to 0), so its VPU/EUP/MXU work is
    # skipped entirely.  Occupancy comes from SMEM (scalar prefetch).
    occupied = occ_ref[pl.program_id(0) * pl.num_programs(1) + kv] > 0

    @pl.when(occupied)
    def _():
        # e_ij = leaky_relu(f1_i + f2_j): VPU broadcast add (f1/f2 precomputed
        # by Stage 1, f32, lane-dense) -- no in-kernel mat-vec or transpose.
        e = f1_ref[...] + f2_ref[...]                       # [TQ, TK] f32
        if 0.0 <= alpha <= 1.0:
            e = jnp.maximum(e, jnp.float32(alpha) * e)      # LeakyReLU: mul+max
        else:
            e = jnp.where(e > 0.0, e, jnp.float32(alpha) * e)
        s = jnp.where(adj_ref[...] > 0, e, jnp.float32(MASK_VALUE))

        # Online (flash-style) softmax accumulation over the key axis.
        m_prev = m_sc[...]
        m_new = jnp.maximum(m_prev, jnp.max(s, axis=1, keepdims=True))
        corr = jnp.exp(m_prev - m_new)
        p = jnp.exp(s - m_new)                              # f32 probabilities
        l_sc[...] = corr * l_sc[...] + jnp.sum(p, axis=1, keepdims=True)
        acc_sc[...] = corr * acc_sc[...] + jnp.dot(
            p.astype(jnp.bfloat16), h_ref[...],
            preferred_element_type=jnp.float32)
        m_sc[...] = m_new

    @pl.when(kv == pl.num_programs(1) - 1)
    def _():
        # TODO(synk): F.dropout on the attention weights is identity in eval
        # mode; training-mode stochastic dropout (pltpu.prng_*) not implemented.
        # NOTE: rows with no unmasked neighbour degenerate to a uniform average
        # over key block 0 (the reference gives uniform over all n); padded
        # rows hitting this path are sliced off by the wrapper.
        l = jnp.maximum(l_sc[...], jnp.float32(1e-30))
        out = acc_sc[...] * pl.reciprocal(l, approx=True)
        if concat:
            out = jnp.where(out > 0.0, out, jnp.exp(out) - 1.0)   # ELU
        o_ref[...] = out.astype(o_ref.dtype)


def _attention(occ, f1, f2, adjp, h_bf16, tq, tk, alpha, concat):
    n_p = adjp.shape[0]
    d_p = h_bf16.shape[1]
    nq, nk = n_p // tq, n_p // tk
    kind = _device_kind()

    adj_index_map = lambda i, k, occ_r: (i, k)
    adj_spec = pl.BlockSpec((tq, tk), adj_index_map)
    if "v5" in kind:
        # v5e: the adj DMA is the exposed critical path and VMEM is plentiful
        # -> triple-buffer the adjacency stream.
        try:
            adj_spec = pl.BlockSpec((tq, tk), adj_index_map,
                                    pipeline_mode=pl.Buffered(3))
        except Exception:
            adj_spec = pl.BlockSpec((tq, tk), adj_index_map)

    # Scoped-VMEM budget: in-kernel [TQ,TK] f32 intermediates + buffered tiles,
    # capped per generation (v7x has only 64 MiB/TC).
    interm = 5 * tq * tk * 4
    bufs = (3 * tq * tk + 2 * tk * d_p * 2 + 2 * tq * d_p * 4 + 4 * tq * 128 * 4)
    scratch = tq * d_p * 4 + 2 * tq * 128 * 4
    cap = (96 << 20) if ("v5" in kind or "v6" in kind) else (48 << 20)
    vmem_bytes = int(min(max(interm + bufs + scratch + (8 << 20), 32 << 20), cap))

    kernel = functools.partial(_gat_attn_kernel, alpha=alpha, concat=concat)
    grid_spec = pltpu.PrefetchScalarGridSpec(
        num_scalar_prefetch=1,
        grid=(nq, nk),
        in_specs=[
            pl.BlockSpec((tq, 1), lambda i, k, occ_r: (i, 0)),    # f1  [TQ,1] f32
            pl.BlockSpec((1, tk), lambda i, k, occ_r: (0, k)),    # f2  [1,TK] f32
            adj_spec,                                             # adj [TQ,TK] i8
            pl.BlockSpec((tk, d_p), lambda i, k, occ_r: (k, 0)),  # h   [TK,Dp] bf16
        ],
        out_specs=pl.BlockSpec((tq, d_p), lambda i, k, occ_r: (i, 0)),
        scratch_shapes=[
            pltpu.VMEM((tq, 1), jnp.float32),    # running max
            pltpu.VMEM((tq, 1), jnp.float32),    # running sum
            pltpu.VMEM((tq, d_p), jnp.float32),  # output accumulator
        ],
    )
    return pl.pallas_call(
        kernel,
        out_shape=jax.ShapeDtypeStruct((n_p, d_p), jnp.float32),
        grid_spec=grid_spec,
        compiler_params=pltpu.CompilerParams(
            dimension_semantics=("parallel", "arbitrary"),
            vmem_limit_bytes=vmem_bytes,
        ),
    )(occ, f1, f2, adjp, h_bf16)


# -----------------------------------------------------------------------------
# Wrapper
# -----------------------------------------------------------------------------
def graph_attention(x, adj, W, a1, a2, *, alpha=0.2, concat=True, dropout=0.0,
                    prepared=None, tq=None, tk=None):
    n, d_in = x.shape
    d_in_w, d_out = W.shape
    assert d_in == d_in_w
    assert a1.shape == (d_in, 1) and a2.shape == (d_in, 1)
    # The reference module multiplies h ([N, out_features]) by a1/a2 of shape
    # (in_features, 1); it only type-checks when in_features == out_features.
    assert d_in == d_out
    del dropout  # identity in eval mode (see TODO in the kernel)

    if prepared is None:
        assert adj is not None
        prepared = prepare_adjacency(adj, tq=tq, tk=tk)
    adjp, occ, n_p, tq, tk = prepared
    assert n_p >= n

    d_p = _round_up(d_out, 128)
    d_aug = d_p + 128
    f32 = jnp.float32

    # Fold a1/a2 into an augmented projection weight: f1 = x @ (W a1) and
    # f2 = x @ (W a2) fall out of the Stage-1 matmul (extra 128-lane block),
    # removing the separate f32 h write / re-read / mat-vec passes while
    # keeping f1/f2 in f32 before the exp.
    xp = jnp.zeros((n_p, d_in), f32).at[:n, :].set(x.astype(f32))
    w_aug = jnp.zeros((d_in, d_aug), f32)
    w_aug = w_aug.at[:, :d_out].set(W.astype(f32))
    w_aug = w_aug.at[:, d_p].set((W.astype(f32) @ a1.astype(f32))[:, 0])
    w_aug = w_aug.at[:, d_p + 1].set((W.astype(f32) @ a2.astype(f32))[:, 0])

    # Stage 1 (Pallas): bf16 h (for the PV matmul) + f32 f1/f2 in one pass.
    h_bf16, f_all = _project(xp, w_aug, d_p)
    f1 = f_all[:, 0:1]                    # [n_p, 1] f32
    f2 = f_all[:, 1].reshape(1, n_p)      # [1, n_p] f32, lane-dense row

    # Stage 2 (Pallas): masked online-softmax attention + aggregation (+ ELU).
    out_p = _attention(occ, f1, f2, adjp, h_bf16, tq, tk, alpha, concat)
    return out_p[:n, :d_out]


# -----------------------------------------------------------------------------
# Reference / test
# -----------------------------------------------------------------------------
def _xavier_normal(key, shape, gain):
    fan_in, fan_out = shape
    std = gain * jnp.sqrt(2.0 / (fan_in + fan_out))
    return std * jax.random.normal(key, shape, dtype=jnp.float32)


def _reference(x, adj, W, a1, a2, *, alpha=0.2, concat=True):
    h = x @ W
    e = (h @ a1) + (h @ a2).T
    e = jnp.where(e > 0, e, alpha * e)
    att = jnp.where(adj > 0, e, MASK_VALUE)
    att = jax.nn.softmax(att, axis=1)
    hp = att @ h
    if concat:
        hp = jnp.where(hp > 0, hp, jnp.exp(hp) - 1.0)
    return hp


if __name__ == "__main__":
    # 300 nodes (pads to 384) with 32 features (in == out, as the module's
    # a1/a2 shapes require).  Banded + random adjacency with self loops: block-
    # sparse enough that the occupancy-skip path is exercised at small tiles,
    # while every node keeps at least one neighbour.
    N, D = 300, 32
    alpha, concat = 0.2, True

    key = jax.random.PRNGKey(0)
    k_x, k_adj, k_w, k_a1, k_a2 = jax.random.split(key, 5)

    x = jax.random.normal(k_x, (N, D), dtype=jnp.float32)
    idx = jnp.arange(N)
    band = jnp.abs(idx[:, None] - idx[None, :]) < 48
    rnd = jax.random.uniform(k_adj, (N, N)) > 0.5
    adj = jnp.where(band & rnd, 1.0, 0.0).astype(jnp.float32)
    adj = jnp.maximum(adj, jnp.eye(N, dtype=jnp.float32))   # self loops

    gain = 1.414
    W = _xavier_normal(k_w, (D, D), gain)
    a1 = _xavier_normal(k_a1, (D, 1), gain)
    a2 = _xavier_normal(k_a2, (D, 1), gain)

    ref = _reference(x, adj, W, a1, a2, alpha=alpha, concat=concat)

    # (a) Default (large-tile) config with the adjacency prepared once and
    #     cached -- the intended production path for a static graph.
    prepared = prepare_adjacency(adj)
    out = graph_attention(x, adj, W, a1, a2, alpha=alpha, concat=concat,
                          prepared=prepared)
    out = jax.block_until_ready(out)
    assert out.shape == (N, D)
    err_a = float(jnp.max(jnp.abs(out - ref)))
    # bf16 PV matmul + approx reciprocal -> looser tolerance than pure f32.
    assert jnp.allclose(out, ref, atol=5e-2, rtol=5e-2), err_a

    # (b) Forced small tiles: multi-key-block online softmax, padding and the
    #     block-sparsity skip path all get exercised.
    out2 = graph_attention(x, adj, W, a1, a2, alpha=alpha, concat=concat,
                           tq=128, tk=128)
    out2 = jax.block_until_ready(out2)
    err_b = float(jnp.max(jnp.abs(out2 - ref)))
    assert jnp.allclose(out2, ref, atol=5e-2, rtol=5e-2), err_b

    print("KERNEL_OK")
</pallas_src>

<mosaic_0001>
module attributes {stable_mosaic.version = 11 : i64} {
  func.func @_proj_kernel(%arg0: i32, %arg1: memref<384x32xf32, #tpu.memory_space<vmem>>, %arg2: memref<32x256xf32, #tpu.memory_space<vmem>>, %arg3: memref<384x128xbf16, #tpu.memory_space<vmem>>, %arg4: memref<384x128xf32, #tpu.memory_space<vmem>>) attributes {dimension_semantics = [#tpu.dimension_semantics<parallel>], iteration_bounds = array<i64: 1>, scalar_prefetch = 0 : i64, scratch_operands = 0 : i64, tpu.core_type = #tpu.core_type<tc>, window_params = [{transform_indices = @transform_0, window_bounds = array<i64: 384, 32>}, {pipeline_mode = #tpu.pipeline_mode<synchronous>, transform_indices = @transform_1, window_bounds = array<i64: 32, 256>}, {transform_indices = @transform_2, window_bounds = array<i64: 384, 128>}, {transform_indices = @transform_3, window_bounds = array<i64: 384, 128>}]} {
    %c0 = arith.constant 0 : index
    %c0_0 = arith.constant 0 : index
    %0 = vector.load %arg1[%c0, %c0_0] : memref<384x32xf32, #tpu.memory_space<vmem>>, vector<384x32xf32>
    %c0_1 = arith.constant 0 : index
    %c0_2 = arith.constant 0 : index
    %1 = vector.load %arg2[%c0_1, %c0_2] : memref<32x256xf32, #tpu.memory_space<vmem>>, vector<32x256xf32>
    %cst = arith.constant dense<0.000000e+00> : vector<384x256xf32>
    %2 = tpu.matmul %0, %1, %cst {dimension_numbers = #tpu.dot_dimension_numbers<[1], [0], [0], [1], [0, 0, 1, 1], [], []>} : vector<384x32xf32>, vector<32x256xf32>, vector<384x256xf32> -> vector<384x256xf32>
    %3 = vector.extract_strided_slice %2 {offsets = [0, 0], sizes = [384, 128], strides = [1, 1]} : vector<384x256xf32> to vector<384x128xf32>
    %4 = arith.truncf %3 : vector<384x128xf32> to vector<384x128xbf16>
    %c0_3 = arith.constant 0 : index
    %c0_4 = arith.constant 0 : index
    %5 = vector.load %arg3[%c0_3, %c0_4] : memref<384x128xbf16, #tpu.memory_space<vmem>>, vector<384x128xbf16>
    tpu.vector_store %arg3[%c0_3, %c0_4], %4 {strides = array<i32>} : memref<384x128xbf16, #tpu.memory_space<vmem>>, vector<384x128xbf16>,
    %6 = vector.extract_strided_slice %2 {offsets = [0, 128], sizes = [384, 128], strides = [1, 1]} : vector<384x256xf32> to vector<384x128xf32>
    %c0_5 = arith.constant 0 : index
    %c0_6 = arith.constant 0 : index
    %7 = vector.load %arg4[%c0_5, %c0_6] : memref<384x128xf32, #tpu.memory_space<vmem>>, vector<384x128xf32>
    tpu.vector_store %arg4[%c0_5, %c0_6], %6 {strides = array<i32>} : memref<384x128xf32, #tpu.memory_space<vmem>>, vector<384x128xf32>,
    return
  }
  func.func @transform_0(%arg0: i32) -> (i32, i32) {
    %c0_i32 = arith.constant 0 : i32
    %c0_i32_0 = arith.constant 0 : i32
    return %arg0, %c0_i32 : i32, i32
  }
  func.func @transform_1(%arg0: i32) -> (i32, i32) {
    %c0_i32 = arith.constant 0 : i32
    %c0_i32_0 = arith.constant 0 : i32
    %c0_i32_1 = arith.constant 0 : i32
    return %c0_i32, %c0_i32_0 : i32, i32
  }
  func.func @transform_2(%arg0: i32) -> (i32, i32) {
    %c0_i32 = arith.constant 0 : i32
    %c0_i32_0 = arith.constant 0 : i32
    return %arg0, %c0_i32 : i32, i32
  }
  func.func @transform_3(%arg0: i32) -> (i32, i32) {
    %c0_i32 = arith.constant 0 : i32
    %c0_i32_0 = arith.constant 0 : i32
    return %arg0, %c0_i32 : i32, i32
  }
}

</mosaic_0001>

<bundles_post_ra>
// kernel: tpu_custom_call.1
= control target key start
LH: loop header
LB: loop body
LE: loop exit
PB: predicated region body
PF: predicated region fallthrough
CT: control target
= control target key end

     0   :  { %9 = vsyncpa [#allocation3], 0  ;;  %vm71_vm0 = vcmask 261120   ;;  %v1235_v10 = vmov 0.0   ;;  %s1539_s0 = inlined_call_operand.vmem [shape: f32[384,32], index: 0, kind: input, shape index: {}]   ;;  %s1540_s1 = inlined_call_operand.vmem [shape: f32[32,256], index: 1, kind: input, shape index: {}]   ;;  %s1541_s2 = inlined_call_operand.hbm [shape: bf16[384,128], index: 2, kind: output, shape index: {0}]   ;;  %s1542_s3 = inlined_call_operand.hbm [shape: f32[384,128], index: 3, kind: output, shape index: {1}]  }
   0x1   :  { %v70_v0 = vld [vmem:[%s1540_s1 + $0x38] sm:$0xff]  ;;  %v69_v1 = vld [vmem:[%s1540_s1 + $0x30] sm:$0xff]  ;;  %v68_v2 = vld [vmem:[%s1540_s1 + $0x28] sm:$0xff]  ;;  %280 = vmatprep.mubr.f32.mxu0 %v1235_v10  ;;  %424 = vmatprep.mubr.f32.mxu1 %v1235_v10 }
   0x2   :  { %240 = vmatprep.subr.mxu0 %v70_v0  ;;  %1176 = vmatprep.subr.mxu1 %v70_v0  ;;  %v67_v3 = vld [vmem:[%s1540_s1 + $0x20] sm:$0xff]  ;;  %v66_v4 = vld [vmem:[%s1540_s1 + $0x18] sm:$0xff]  ;;  %v65_v5 = vld [vmem:[%s1540_s1 + $0x10] sm:$0xff] }
   0x3   :  { %241 = vmatpush1.msra.mxu0 %v69_v1  ;;  %1180 = vmatpush1.msra.mxu1 %v69_v1  ;;  %v64_v6 = vld [vmem:[%s1540_s1 + $0x8] sm:$0xff]  ;;  %v63_v7 = vld [vmem:[%s1540_s1] sm:$0xff]  ;;  %v17_v13 = vld [vmem:[%s1539_s0 + $0x10] sm:$0xff] }
   0x4   :  { %242 = vmatprep.subr.mxu0 %v68_v2  ;;  %1177 = vmatprep.subr.mxu1 %v68_v2  ;;  %v15_v8 = vld [vmem:[%s1539_s0] sm:$0xff]  ;;  %v16_v11 = vld [vmem:[%s1539_s0 + $0x8] sm:$0xff]  ;;  %v41_v14 = vld [vmem:[%s1539_s0 + $0xd0] sm:$0xff] }
   0x5   :  { %243 = vmatpush1.msra.mxu0 %v67_v3  ;;  %1181 = vmatpush1.msra.mxu1 %v67_v3  ;;  %v39_v9 = vld [vmem:[%s1539_s0 + $0xc0] sm:$0xff]  ;;  %v40_v12 = vld [vmem:[%s1539_s0 + $0xc8] sm:$0xff] }
   0x6   :  { %244 = vmatprep.subr.mxu0 %v66_v4  ;;  %1178 = vmatprep.subr.mxu1 %v66_v4 }
   0x7   :  { %245 = vmatpush1.msra.mxu0 %v65_v5  ;;  %1182 = vmatpush1.msra.mxu1 %v65_v5 }
   0x8   :  { %246 = vmatprep.subr.mxu0 %v64_v6  ;;  %1179 = vmatprep.subr.mxu1 %v64_v6 }
   0x9   :  { %247 = vmatpush1.msra.mxu0 %v63_v7  ;;  %1183 = vmatpush1.msra.mxu1 %v63_v7 }
   0xa   :  { %889 = vmatmul.mubr.msk.f32.vlgmr.msra.gmra.mxu0 %vm71_vm0, %v15_v8  ;;  %913 = vmatmul.mubr.msk.f32.vlgmr.msra.gmra.mxu1 %vm71_vm0, %v39_v9 }
   0xb   :  { %286 = vmatprep.mubr.f32.mxu0 %v1235_v10  ;;  %430 = vmatprep.mubr.f32.mxu1 %v1235_v10 }
   0xe   :  { %890 = vmatmul.mubr.msk.f32.gmra.mxu0 %vm71_vm0, %v16_v11  ;;  %914 = vmatmul.mubr.msk.f32.gmra.mxu1 %vm71_vm0, %v40_v12 }
   0xf   :  { %292 = vmatprep.mubr.f32.mxu0 %v1235_v10  ;;  %436 = vmatprep.mubr.f32.mxu1 %v1235_v10 }
  0x12   :  { %891 = vmatmul.mubr.msk.f32.gmra.mxu0 %vm71_vm0, %v17_v13  ;;  %915 = vmatmul.mubr.msk.f32.gmra.mxu1 %vm71_vm0, %v41_v14 }
  0x13   :  { %10 = vsyncpa [#allocation5], 0  ;;  %298 = vmatprep.mubr.f32.mxu0 %v1235_v10  ;;  %442 = vmatprep.mubr.f32.mxu1 %v1235_v10  ;;  %v18_v15 = vld [vmem:[%s1539_s0 + $0x18] sm:$0xff]  ;;  %v19_v17 = vld [vmem:[%s1539_s0 + $0x20] sm:$0xff]  ;;  %s1237_s13 = smov [#allocation4]  }
  0x14   :  { %v42_v16 = vld [vmem:[%s1539_s0 + $0xd8] sm:$0xff]  ;;  %v43_v18 = vld [vmem:[%s1539_s0 + $0xe0] sm:$0xff]  ;;  %v20_v19 = vld [vmem:[%s1539_s0 + $0x28] sm:$0xff]  ;;  %s874_s14 = sshll.u32 %s1237_s13, 4  ;;  %s1526_s14 = int_to_ptr.vmem [resolvable:$true] %s874_s14 }
  0x15   :  { %v44_v20 = vld [vmem:[%s1539_s0 + $0xe8] sm:$0xff]  ;;  %v21_v21 = vld [vmem:[%s1539_s0 + $0x30] sm:$0xff]  ;;  %v22_v23 = vld [vmem:[%s1539_s0 + $0x38] sm:$0xff] }
  0x16   :  { %892 = vmatmul.mubr.msk.f32.gmra.mxu0 %vm71_vm0, %v18_v15  ;;  %916 = vmatmul.mubr.msk.f32.gmra.mxu1 %vm71_vm0, %v42_v16  ;;  %v45_v22 = vld [vmem:[%s1539_s0 + $0xf0] sm:$0xff]  ;;  %v46_v24 = vld [vmem:[%s1539_s0 + $0xf8] sm:$0xff]  ;;  %v23_v25 = vld [vmem:[%s1539_s0 + $0x40] sm:$0xff] }
  0x17   :  { %304 = vmatprep.mubr.f32.mxu0 %v1235_v10  ;;  %448 = vmatprep.mubr.f32.mxu1 %v1235_v10  ;;  %v47_v26 = vld [vmem:[%s1539_s0 + $0x100] sm:$0xff]  ;;  %v24_v27 = vld [vmem:[%s1539_s0 + $0x48] sm:$0xff]  ;;  %v25_v29 = vld [vmem:[%s1539_s0 + $0x50] sm:$0xff] }
  0x18   :  { %v48_v28 = vld [vmem:[%s1539_s0 + $0x108] sm:$0xff]  ;;  %v49_v30 = vld [vmem:[%s1539_s0 + $0x110] sm:$0xff]  ;;  %v26_v31 = vld [vmem:[%s1539_s0 + $0x58] sm:$0xff] }
  0x19   :  { %v50_v32 = vld [vmem:[%s1539_s0 + $0x118] sm:$0xff]  ;;  %v27_v33 = vld [vmem:[%s1539_s0 + $0x60] sm:$0xff]  ;;  %v28_v35 = vld [vmem:[%s1539_s0 + $0x68] sm:$0xff] }
  0x1a   :  { %893 = vmatmul.mubr.msk.f32.gmra.mxu0 %vm71_vm0, %v19_v17  ;;  %917 = vmatmul.mubr.msk.f32.gmra.mxu1 %vm71_vm0, %v43_v18  ;;  %v51_v34 = vld [vmem:[%s1539_s0 + $0x120] sm:$0xff]  ;;  %v52_v36 = vld [vmem:[%s1539_s0 + $0x128] sm:$0xff]  ;;  %v29_v37 = vld [vmem:[%s1539_s0 + $0x70] sm:$0xff] }
  0x1b   :  { %310 = vmatprep.mubr.f32.mxu0 %v1235_v10  ;;  %454 = vmatprep.mubr.f32.mxu1 %v1235_v10  ;;  %v53_v38 = vld [vmem:[%s1539_s0 + $0x130] sm:$0xff]  ;;  %v30_v39 = vld [vmem:[%s1539_s0 + $0x78] sm:$0xff]  ;;  %v31_v41 = vld [vmem:[%s1539_s0 + $0x80] sm:$0xff] }
  0x1c   :  { %v54_v40 = vld [vmem:[%s1539_s0 + $0x138] sm:$0xff]  ;;  %v55_v42 = vld [vmem:[%s1539_s0 + $0x140] sm:$0xff]  ;;  %v32_v43 = vld [vmem:[%s1539_s0 + $0x88] sm:$0xff] }
  0x1d   :  { %v56_v44 = vld [vmem:[%s1539_s0 + $0x148] sm:$0xff]  ;;  %v33_v45 = vld [vmem:[%s1539_s0 + $0x90] sm:$0xff]  ;;  %v34_v47 = vld [vmem:[%s1539_s0 + $0x98] sm:$0xff] }
  0x1e   :  { %894 = vmatmul.mubr.msk.f32.gmra.mxu0 %vm71_vm0, %v20_v19  ;;  %918 = vmatmul.mubr.msk.f32.gmra.mxu1 %vm71_vm0, %v44_v20  ;;  %v57_v46 = vld [vmem:[%s1539_s0 + $0x150] sm:$0xff]  ;;  %v58_v48 = vld [vmem:[%s1539_s0 + $0x158] sm:$0xff]  ;;  %v35_v49 = vld [vmem:[%s1539_s0 + $0xa0] sm:$0xff] }
  0x1f   :  { %316 = vmatprep.mubr.f32.mxu0 %v1235_v10  ;;  %460 = vmatprep.mubr.f32.mxu1 %v1235_v10  ;;  %v59_v50 = vld [vmem:[%s1539_s0 + $0x160] sm:$0xff]  ;;  %v36_v51 = vld [vmem:[%s1539_s0 + $0xa8] sm:$0xff]  ;;  %v37_v53 = vld [vmem:[%s1539_s0 + $0xb0] sm:$0xff] }
  0x20   :  { %v60_v52 = vld [vmem:[%s1539_s0 + $0x168] sm:$0xff]  ;;  %v61_v54 = vld [vmem:[%s1539_s0 + $0x170] sm:$0xff]  ;;  %v38_v55 = vld [vmem:[%s1539_s0 + $0xb8] sm:$0xff] }
  0x21   :  { %v62_v56 = vld [vmem:[%s1539_s0 + $0x178] sm:$0xff]  ;;  %s1236_s0 = smov [#allocation2]  }
  0x22   :  { %895 = vmatmul.mubr.msk.f32.gmra.mxu0 %vm71_vm0, %v21_v21  ;;  %919 = vmatmul.mubr.msk.f32.gmra.mxu1 %vm71_vm0, %v45_v22  ;;  %s862_s12 = sshll.u32 %s1236_s0, 4  ;;  %s863_s12 = int_to_ptr.vmem [resolvable:$true] %s862_s12 }
  0x23   :  { %322 = vmatprep.mubr.f32.mxu0 %v1235_v10  ;;  %466 = vmatprep.mubr.f32.mxu1 %v1235_v10  ;;  %s1191_s15 = scalar_lea.vmem %s863_s12, 3072  ;;  %p1196_p1 = scmp.lt.s32.totalorder %s863_s12, %s863_s12 }
  0x24   :  { %p1192_p0 = scmp.ne.s32.totalorder %s863_s12, %s1191_s15  ;;  %p1197_p2 = scmp.lt.s32.totalorder %s1191_s15, %s1191_s15 }
  0x26   :  { %896 = vmatmul.mubr.msk.f32.gmra.mxu0 %vm71_vm0, %v22_v23  ;;  %920 = vmatmul.mubr.msk.f32.gmra.mxu1 %vm71_vm0, %v46_v24  ;;  %p1198_p3 = por %p1197_p2, %p1196_p1 }
  0x27   :  { %328 = vmatprep.mubr.f32.mxu0 %v1235_v10  ;;  %472 = vmatprep.mubr.f32.mxu1 %v1235_v10 }
  0x28   :  { %p1199_p4 = pnand %p1198_p3, %p1192_p0 }
  0x2a   :  { %897 = vmatmul.mubr.msk.f32.gmra.mxu0 %vm71_vm0, %v23_v25  ;;  %921 = vmatmul.mubr.msk.f32.gmra.mxu1 %vm71_vm0, %v47_v26 }
  0x2b   :  { %334 = vmatprep.mubr.f32.mxu0 %v1235_v10  ;;  %478 = vmatprep.mubr.f32.mxu1 %v1235_v10 }
  0x2e   :  { %898 = vmatmul.mubr.msk.f32.gmra.mxu0 %vm71_vm0, %v24_v27  ;;  %922 = vmatmul.mubr.msk.f32.gmra.mxu1 %vm71_vm0, %v48_v28 }
  0x2f   :  { %340 = vmatprep.mubr.f32.mxu0 %v1235_v10  ;;  %484 = vmatprep.mubr.f32.mxu1 %v1235_v10 }
  0x32   :  { %899 = vmatmul.mubr.msk.f32.gmra.mxu0 %vm71_vm0, %v25_v29  ;;  %923 = vmatmul.mubr.msk.f32.gmra.mxu1 %vm71_vm0, %v49_v30 }
  0x33   :  { %346 = vmatprep.mubr.f32.mxu0 %v1235_v10  ;;  %490 = vmatprep.mubr.f32.mxu1 %v1235_v10 }
  0x36   :  { %900 = vmatmul.mubr.msk.f32.gmra.mxu0 %vm71_vm0, %v26_v31  ;;  %924 = vmatmul.mubr.msk.f32.gmra.mxu1 %vm71_vm0, %v50_v32 }
  0x37   :  { %352 = vmatprep.mubr.f32.mxu0 %v1235_v10  ;;  %496 = vmatprep.mubr.f32.mxu1 %v1235_v10 }
  0x3a   :  { %901 = vmatmul.mubr.msk.f32.gmra.mxu0 %vm71_vm0, %v27_v33  ;;  %925 = vmatmul.mubr.msk.f32.gmra.mxu1 %vm71_vm0, %v51_v34 }
  0x3b   :  { %358 = vmatprep.mubr.f32.mxu0 %v1235_v10  ;;  %502 = vmatprep.mubr.f32.mxu1 %v1235_v10 }
  0x3e   :  { %902 = vmatmul.mubr.msk.f32.gmra.mxu0 %vm71_vm0, %v28_v35  ;;  %926 = vmatmul.mubr.msk.f32.gmra.mxu1 %vm71_vm0, %v52_v36 }
  0x3f   :  { %364 = vmatprep.mubr.f32.mxu0 %v1235_v10  ;;  %508 = vmatprep.mubr.f32.mxu1 %v1235_v10 }
  0x42   :  { %903 = vmatmul.mubr.msk.f32.gmra.mxu0 %vm71_vm0, %v29_v37  ;;  %927 = vmatmul.mubr.msk.f32.gmra.mxu1 %vm71_vm0, %v53_v38 }
  0x43   :  { %370 = vmatprep.mubr.f32.mxu0 %v1235_v10  ;;  %514 = vmatprep.mubr.f32.mxu1 %v1235_v10 }
  0x46   :  { %904 = vmatmul.mubr.msk.f32.gmra.mxu0 %vm71_vm0, %v30_v39  ;;  %928 = vmatmul.mubr.msk.f32.gmra.mxu1 %vm71_vm0, %v54_v40 }
  0x47   :  { %376 = vmatprep.mubr.f32.mxu0 %v1235_v10  ;;  %520 = vmatprep.mubr.f32.mxu1 %v1235_v10 }
  0x4a   :  { %905 = vmatmul.mubr.msk.f32.gmra.mxu0 %vm71_vm0, %v31_v41  ;;  %929 = vmatmul.mubr.msk.f32.gmra.mxu1 %vm71_vm0, %v55_v42 }
  0x4b   :  { %382 = vmatprep.mubr.f32.mxu0 %v1235_v10  ;;  %526 = vmatprep.mubr.f32.mxu1 %v1235_v10 }
  0x4e   :  { %906 = vmatmul.mubr.msk.f32.gmra.mxu0 %vm71_vm0, %v32_v43  ;;  %930 = vmatmul.mubr.msk.f32.gmra.mxu1 %vm71_vm0, %v56_v44 }
  0x4f   :  { %388 = vmatprep.mubr.f32.mxu0 %v1235_v10  ;;  %532 = vmatprep.mubr.f32.mxu1 %v1235_v10 }
  0x52   :  { %907 = vmatmul.mubr.msk.f32.gmra.mxu0 %vm71_vm0, %v33_v45  ;;  %931 = vmatmul.mubr.msk.f32.gmra.mxu1 %vm71_vm0, %v57_v46 }
  0x53   :  { %394 = vmatprep.mubr.f32.mxu0 %v1235_v10  ;;  %538 = vmatprep.mubr.f32.mxu1 %v1235_v10 }
  0x56   :  { %908 = vmatmul.mubr.msk.f32.gmra.mxu0 %vm71_vm0, %v34_v47  ;;  %932 = vmatmul.mubr.msk.f32.gmra.mxu1 %vm71_vm0, %v58_v48 }
  0x57   :  { %400 = vmatprep.mubr.f32.mxu0 %v1235_v10  ;;  %544 = vmatprep.mubr.f32.mxu1 %v1235_v10 }
  0x5a   :  { %909 = vmatmul.mubr.msk.f32.gmra.mxu0 %vm71_vm0, %v35_v49  ;;  %933 = vmatmul.mubr.msk.f32.gmra.mxu1 %vm71_vm0, %v59_v50 }
  0x5b   :  { %406 = vmatprep.mubr.f32.mxu0 %v1235_v10  ;;  %550 = vmatprep.mubr.f32.mxu1 %v1235_v10 }
  0x5e   :  { %910 = vmatmul.mubr.msk.f32.gmra.mxu0 %vm71_vm0, %v36_v51  ;;  %934 = vmatmul.mubr.msk.f32.gmra.mxu1 %vm71_vm0, %v60_v52 }
  0x5f   :  { %412 = vmatprep.mubr.f32.mxu0 %v1235_v10  ;;  %556 = vmatprep.mubr.f32.mxu1 %v1235_v10 }
  0x62   :  { %911 = vmatmul.mubr.msk.f32.gmra.mxu0 %vm71_vm0, %v37_v53  ;;  %935 = vmatmul.mubr.msk.f32.gmra.mxu1 %vm71_vm0, %v61_v54 }
  0x63   :  { %418 = vmatprep.mubr.f32.mxu0 %v1235_v10  ;;  %562 = vmatprep.mubr.f32.mxu1 %v1235_v10 }
  0x66   :  { %912 = vmatmul.mubr.msk.f32.gmra.mxu0 %vm71_vm0, %v38_v55  ;;  %936 = vmatmul.mubr.msk.f32.gmra.mxu1 %vm71_vm0, %v62_v56 }
  0xca   :  { %v282_v57 = vpop.f32.mrf.mxu0  ;;  %v426_v58 = vpop.f32.mrf.mxu1 }
  0xcc   :  { %v284_v59 = vpop.f32.mrf.mxu0  ;;  %v428_v60 = vpop.f32.mrf.mxu1 }
  0xcd   :  { %809 = vst [vmem:[#allocation4] sm:$0xff] %v284_v59  ;;  %833 = vst [vmem:[#allocation4 + $0xc0] sm:$0xff] %v428_v60 }
  0xce   :  { %v288_v61 = vpop.f32.mrf.mxu0  ;;  %v432_v62 = vpop.f32.mrf.mxu1 }
  0xcf   :  { %v1036_v63 = vpack.c.bf16 %v288_v61, %v282_v57  ;;  %v1096_v0 = vpack.c.bf16 %v432_v62, %v426_v58 }
  0xd0   :  { %v290_v1 = vpop.f32.mrf.mxu0  ;;  %v434_v2 = vpop.f32.mrf.mxu1 }
  0xd1   :  { %1037 = vst [vmem:[#allocation2] sm:$0xff] %v1036_v63   ;;  %1164 = vst [vmem:[#allocation2 + $0x60] sm:$0xff] %v1096_v0  }
  0xd2   :  { %810 = vst [vmem:[#allocation4 + $0x8] sm:$0xff] %v290_v1  ;;  %834 = vst [vmem:[#allocation4 + $0xc8] sm:$0xff] %v434_v2  ;;  %v294_v3 = vpop.f32.mrf.mxu0  ;;  %v438_v4 = vpop.f32.mrf.mxu1 }
  0xd4   :  { %v296_v5 = vpop.f32.mrf.mxu0  ;;  %v440_v6 = vpop.f32.mrf.mxu1 }
  0xd5   :  { %811 = vst [vmem:[#allocation4 + $0x10] sm:$0xff] %v296_v5  ;;  %835 = vst [vmem:[#allocation4 + $0xd0] sm:$0xff] %v440_v6 }
  0xd6   :  { %v300_v7 = vpop.f32.mrf.mxu0  ;;  %v444_v8 = vpop.f32.mrf.mxu1 }
  0xd7   :  { %v1041_v9 = vpack.c.bf16 %v300_v7, %v294_v3  ;;  %v1101_v10 = vpack.c.bf16 %v444_v8, %v438_v4 }
  0xd8   :  { %v302_v11 = vpop.f32.mrf.mxu0  ;;  %v446_v12 = vpop.f32.mrf.mxu1 }
  0xd9   :  { %1153 = vst [vmem:[#allocation2 + $0x8] sm:$0xff] %v1041_v9   ;;  %1165 = vst [vmem:[#allocation2 + $0x68] sm:$0xff] %v1101_v10  }
  0xda   :  { %812 = vst [vmem:[#allocation4 + $0x18] sm:$0xff] %v302_v11  ;;  %836 = vst [vmem:[#allocation4 + $0xd8] sm:$0xff] %v446_v12  ;;  %v306_v13 = vpop.f32.mrf.mxu0  ;;  %v450_v14 = vpop.f32.mrf.mxu1 }
  0xdc   :  { %v308_v15 = vpop.f32.mrf.mxu0  ;;  %v452_v16 = vpop.f32.mrf.mxu1 }
  0xdd   :  { %813 = vst [vmem:[#allocation4 + $0x20] sm:$0xff] %v308_v15  ;;  %837 = vst [vmem:[#allocation4 + $0xe0] sm:$0xff] %v452_v16 }
  0xde   :  { %v312_v17 = vpop.f32.mrf.mxu0  ;;  %v456_v18 = vpop.f32.mrf.mxu1 }
  0xdf   :  { %v1046_v19 = vpack.c.bf16 %v312_v17, %v306_v13  ;;  %v1106_v20 = vpack.c.bf16 %v456_v18, %v450_v14 }
  0xe0   :  { %v314_v21 = vpop.f32.mrf.mxu0  ;;  %v458_v22 = vpop.f32.mrf.mxu1 }
  0xe1   :  { %1154 = vst [vmem:[#allocation2 + $0x10] sm:$0xff] %v1046_v19   ;;  %1166 = vst [vmem:[#allocation2 + $0x70] sm:$0xff] %v1106_v20  }
  0xe2   :  { %814 = vst [vmem:[#allocation4 + $0x28] sm:$0xff] %v314_v21  ;;  %838 = vst [vmem:[#allocation4 + $0xe8] sm:$0xff] %v458_v22  ;;  %v318_v23 = vpop.f32.mrf.mxu0  ;;  %v462_v24 = vpop.f32.mrf.mxu1 }
  0xe4   :  { %v320_v25 = vpop.f32.mrf.mxu0  ;;  %v464_v26 = vpop.f32.mrf.mxu1 }
  0xe5   :  { %815 = vst [vmem:[#allocation4 + $0x30] sm:$0xff] %v320_v25  ;;  %839 = vst [vmem:[#allocation4 + $0xf0] sm:$0xff] %v464_v26 }
  0xe6   :  { %v324_v27 = vpop.f32.mrf.mxu0  ;;  %v468_v28 = vpop.f32.mrf.mxu1 }
  0xe7   :  { %v1051_v29 = vpack.c.bf16 %v324_v27, %v318_v23  ;;  %v1111_v30 = vpack.c.bf16 %v468_v28, %v462_v24 }
  0xe8   :  { %v326_v31 = vpop.f32.mrf.mxu0  ;;  %v470_v32 = vpop.f32.mrf.mxu1 }
  0xe9   :  { %1155 = vst [vmem:[#allocation2 + $0x18] sm:$0xff] %v1051_v29   ;;  %1167 = vst [vmem:[#allocation2 + $0x78] sm:$0xff] %v1111_v30  }
  0xea   :  { %816 = vst [vmem:[#allocation4 + $0x38] sm:$0xff] %v326_v31  ;;  %840 = vst [vmem:[#allocation4 + $0xf8] sm:$0xff] %v470_v32  ;;  %v330_v33 = vpop.f32.mrf.mxu0  ;;  %v474_v34 = vpop.f32.mrf.mxu1 }
  0xec   :  { %v332_v35 = vpop.f32.mrf.mxu0  ;;  %v476_v36 = vpop.f32.mrf.mxu1 }
  0xed   :  { %817 = vst [vmem:[#allocation4 + $0x40] sm:$0xff] %v332_v35  ;;  %841 = vst [vmem:[#allocation4 + $0x100] sm:$0xff] %v476_v36 }
  0xee   :  { %v336_v37 = vpop.f32.mrf.mxu0  ;;  %v480_v38 = vpop.f32.mrf.mxu1 }
  0xef   :  { %v1056_v39 = vpack.c.bf16 %v336_v37, %v330_v33  ;;  %v1116_v40 = vpack.c.bf16 %v480_v38, %v474_v34 }
  0xf0   :  { %v338_v41 = vpop.f32.mrf.mxu0  ;;  %v482_v42 = vpop.f32.mrf.mxu1 }
  0xf1   :  { %1156 = vst [vmem:[#allocation2 + $0x20] sm:$0xff] %v1056_v39   ;;  %1168 = vst [vmem:[#allocation2 + $0x80] sm:$0xff] %v1116_v40  }
  0xf2   :  { %818 = vst [vmem:[#allocation4 + $0x48] sm:$0xff] %v338_v41  ;;  %842 = vst [vmem:[#allocation4 + $0x108] sm:$0xff] %v482_v42  ;;  %v342_v43 = vpop.f32.mrf.mxu0  ;;  %v486_v44 = vpop.f32.mrf.mxu1 }
  0xf4   :  { %v344_v45 = vpop.f32.mrf.mxu0  ;;  %v488_v46 = vpop.f32.mrf.mxu1 }
  0xf5   :  { %819 = vst [vmem:[#allocation4 + $0x50] sm:$0xff] %v344_v45  ;;  %843 = vst [vmem:[#allocation4 + $0x110] sm:$0xff] %v488_v46 }
  0xf6   :  { %v348_v47 = vpop.f32.mrf.mxu0  ;;  %v492_v48 = vpop.f32.mrf.mxu1 }
  0xf7   :  { %v1061_v49 = vpack.c.bf16 %v348_v47, %v342_v43  ;;  %v1121_v50 = vpack.c.bf16 %v492_v48, %v486_v44 }
  0xf8   :  { %v350_v51 = vpop.f32.mrf.mxu0  ;;  %v494_v52 = vpop.f32.mrf.mxu1 }
  0xf9   :  { %1157 = vst [vmem:[#allocation2 + $0x28] sm:$0xff] %v1061_v49   ;;  %1169 = vst [vmem:[#allocation2 + $0x88] sm:$0xff] %v1121_v50  }
  0xfa   :  { %820 = vst [vmem:[#allocation4 + $0x58] sm:$0xff] %v350_v51  ;;  %844 = vst [vmem:[#allocation4 + $0x118] sm:$0xff] %v494_v52  ;;  %v354_v53 = vpop.f32.mrf.mxu0  ;;  %v498_v54 = vpop.f32.mrf.mxu1 }
  0xfc   :  { %v356_v55 = vpop.f32.mrf.mxu0  ;;  %v500_v56 = vpop.f32.mrf.mxu1 }
  0xfd   :  { %821 = vst [vmem:[#allocation4 + $0x60] sm:$0xff] %v356_v55  ;;  %845 = vst [vmem:[#allocation4 + $0x120] sm:$0xff] %v500_v56 }
  0xfe   :  { %v360_v57 = vpop.f32.mrf.mxu0  ;;  %v504_v58 = vpop.f32.mrf.mxu1 }
  0xff   :  { %v1066_v59 = vpack.c.bf16 %v360_v57, %v354_v53  ;;  %v1126_v60 = vpack.c.bf16 %v504_v58, %v498_v54 }
 0x100   :  { %v362_v61 = vpop.f32.mrf.mxu0  ;;  %v506_v62 = vpop.f32.mrf.mxu1 }
 0x101   :  { %1158 = vst [vmem:[#allocation2 + $0x30] sm:$0xff] %v1066_v59   ;;  %1170 = vst [vmem:[#allocation2 + $0x90] sm:$0xff] %v1126_v60  }
 0x102   :  { %822 = vst [vmem:[#allocation4 + $0x68] sm:$0xff] %v362_v61  ;;  %846 = vst [vmem:[#allocation4 + $0x128] sm:$0xff] %v506_v62  ;;  %v366_v63 = vpop.f32.mrf.mxu0  ;;  %v510_v0 = vpop.f32.mrf.mxu1 }
 0x104   :  { %v368_v1 = vpop.f32.mrf.mxu0  ;;  %v512_v2 = vpop.f32.mrf.mxu1 }
 0x105   :  { %823 = vst [vmem:[#allocation4 + $0x70] sm:$0xff] %v368_v1  ;;  %847 = vst [vmem:[#allocation4 + $0x130] sm:$0xff] %v512_v2 }
 0x106   :  { %v372_v3 = vpop.f32.mrf.mxu0  ;;  %v516_v4 = vpop.f32.mrf.mxu1 }
 0x107   :  { %v1071_v5 = vpack.c.bf16 %v372_v3, %v366_v63  ;;  %v1131_v6 = vpack.c.bf16 %v516_v4, %v510_v0 }
 0x108   :  { %v374_v7 = vpop.f32.mrf.mxu0  ;;  %v518_v8 = vpop.f32.mrf.mxu1 }
 0x109   :  { %1159 = vst [vmem:[#allocation2 + $0x38] sm:$0xff] %v1071_v5   ;;  %1171 = vst [vmem:[#allocation2 + $0x98] sm:$0xff] %v1131_v6  }
 0x10a   :  { %824 = vst [vmem:[#allocation4 + $0x78] sm:$0xff] %v374_v7  ;;  %848 = vst [vmem:[#allocation4 + $0x138] sm:$0xff] %v518_v8  ;;  %v378_v9 = vpop.f32.mrf.mxu0  ;;  %v522_v10 = vpop.f32.mrf.mxu1 }
 0x10c   :  { %v380_v11 = vpop.f32.mrf.mxu0  ;;  %v524_v12 = vpop.f32.mrf.mxu1 }
 0x10d   :  { %825 = vst [vmem:[#allocation4 + $0x80] sm:$0xff] %v380_v11  ;;  %849 = vst [vmem:[#allocation4 + $0x140] sm:$0xff] %v524_v12 }
 0x10e   :  { %v384_v13 = vpop.f32.mrf.mxu0  ;;  %v528_v14 = vpop.f32.mrf.mxu1 }
 0x10f   :  { %v1076_v15 = vpack.c.bf16 %v384_v13, %v378_v9  ;;  %v1136_v16 = vpack.c.bf16 %v528_v14, %v522_v10 }
 0x110   :  { %v386_v17 = vpop.f32.mrf.mxu0  ;;  %v530_v18 = vpop.f32.mrf.mxu1 }
 0x111   :  { %1160 = vst [vmem:[#allocation2 + $0x40] sm:$0xff] %v1076_v15   ;;  %1172 = vst [vmem:[#allocation2 + $0xa0] sm:$0xff] %v1136_v16  }
 0x112   :  { %826 = vst [vmem:[#allocation4 + $0x88] sm:$0xff] %v386_v17  ;;  %850 = vst [vmem:[#allocation4 + $0x148] sm:$0xff] %v530_v18  ;;  %v390_v19 = vpop.f32.mrf.mxu0  ;;  %v534_v20 = vpop.f32.mrf.mxu1 }
 0x114   :  { %v392_v21 = vpop.f32.mrf.mxu0  ;;  %v536_v22 = vpop.f32.mrf.mxu1 }
 0x115   :  { %827 = vst [vmem:[#allocation4 + $0x90] sm:$0xff] %v392_v21  ;;  %851 = vst [vmem:[#allocation4 + $0x150] sm:$0xff] %v536_v22 }
 0x116   :  { %v396_v23 = vpop.f32.mrf.mxu0  ;;  %v540_v24 = vpop.f32.mrf.mxu1 }
 0x117   :  { %v1081_v25 = vpack.c.bf16 %v396_v23, %v390_v19  ;;  %v1141_v26 = vpack.c.bf16 %v540_v24, %v534_v20 }
 0x118   :  { %v398_v27 = vpop.f32.mrf.mxu0  ;;  %v542_v28 = vpop.f32.mrf.mxu1 }
 0x119   :  { %1161 = vst [vmem:[#allocation2 + $0x48] sm:$0xff] %v1081_v25   ;;  %1173 = vst [vmem:[#allocation2 + $0xa8] sm:$0xff] %v1141_v26  }
 0x11a   :  { %828 = vst [vmem:[#allocation4 + $0x98] sm:$0xff] %v398_v27  ;;  %852 = vst [vmem:[#allocation4 + $0x158] sm:$0xff] %v542_v28  ;;  %v402_v29 = vpop.f32.mrf.mxu0  ;;  %v546_v30 = vpop.f32.mrf.mxu1 }
 0x11c   :  { %v404_v31 = vpop.f32.mrf.mxu0  ;;  %v548_v32 = vpop.f32.mrf.mxu1 }
 0x11d   :  { %829 = vst [vmem:[#allocation4 + $0xa0] sm:$0xff] %v404_v31  ;;  %853 = vst [vmem:[#allocation4 + $0x160] sm:$0xff] %v548_v32 }
 0x11e   :  { %v408_v33 = vpop.f32.mrf.mxu0  ;;  %v552_v34 = vpop.f32.mrf.mxu1 }
 0x11f   :  { %v1086_v35 = vpack.c.bf16 %v408_v33, %v402_v29  ;;  %v1146_v36 = vpack.c.bf16 %v552_v34, %v546_v30 }
 0x120   :  { %v410_v37 = vpop.f32.mrf.mxu0  ;;  %v554_v38 = vpop.f32.mrf.mxu1 }
 0x121   :  { %1162 = vst [vmem:[#allocation2 + $0x50] sm:$0xff] %v1086_v35   ;;  %1174 = vst [vmem:[#allocation2 + $0xb0] sm:$0xff] %v1146_v36  }
 0x122   :  { %830 = vst [vmem:[#allocation4 + $0xa8] sm:$0xff] %v410_v37  ;;  %854 = vst [vmem:[#allocation4 + $0x168] sm:$0xff] %v554_v38  ;;  %v414_v39 = vpop.f32.mrf.mxu0  ;;  %v558_v40 = vpop.f32.mrf.mxu1 }
 0x124   :  { %v416_v41 = vpop.f32.mrf.mxu0  ;;  %v560_v42 = vpop.f32.mrf.mxu1 }
 0x125   :  { %831 = vst [vmem:[#allocation4 + $0xb0] sm:$0xff] %v416_v41  ;;  %855 = vst [vmem:[#allocation4 + $0x170] sm:$0xff] %v560_v42 }
 0x126   :  { %v420_v43 = vpop.f32.mrf.mxu0  ;;  %v564_v44 = vpop.f32.mrf.mxu1 }
 0x127   :  { %v1091_v45 = vpack.c.bf16 %v420_v43, %v414_v39  ;;  %v1151_v46 = vpack.c.bf16 %v564_v44, %v558_v40 }
 0x128   :  { %v422_v47 = vpop.f32.mrf.mxu0  ;;  %v566_v48 = vpop.f32.mrf.mxu1 }
 0x129   :  { %1163 = vst [vmem:[#allocation2 + $0x58] sm:$0xff] %v1091_v45   ;;  %1175 = vst [vmem:[#allocation2 + $0xb8] sm:$0xff] %v1151_v46  }
 0x12a   :  { %832 = vst [vmem:[#allocation4 + $0xb8] sm:$0xff] %v422_v47  ;;  %856 = vst [vmem:[#allocation4 + $0x178] sm:$0xff] %v566_v48 }
 0x12b   :  { %1202 = shalt.err (!%p1199_p4)
}
 0x12c   :  { %s1238_s16 = smov 64   ;;  %s1239_s17 = smov 4  }
 0x12d   :  { %868 = dma.vmem_to_hbm [thread:$0]  %s863_s12, 3072, %s1541_s2, [#allocation3], %s1238_s16, %s1238_s16, %s1239_s17  }
 0x12e   :  { %s1211_s20 = scalar_lea.vmem %s1526_s14, 6144  ;;  %p1216_p6 = scmp.lt.s32.totalorder %s1526_s14, %s1526_s14 }
 0x12f   :  { %p1212_p5 = scmp.ne.s32.totalorder %s1526_s14, %s1211_s20  ;;  %p1217_p7 = scmp.lt.s32.totalorder %s1211_s20, %s1211_s20 }
 0x131   :  { %p1218_p8 = por %p1217_p7, %p1216_p6 }
 0x133   :  { %p1219_p9 = pnand %p1218_p8, %p1212_p5 }
 0x135   :  { %1222 = shalt.err (!%p1219_p9)
}
 0x136   :  { %s1240_s21 = smov 128   ;;  %s1241_s22 = smov 8  }
 0x137   :  { %880 = dma.vmem_to_hbm [thread:$0]  %s1526_s14, 6144, %s1542_s3, [#allocation5], %s1240_s21, %s1240_s21, %s1241_s22  }
 0x138   :  { %1231 = dma.done.wait [#allocation3], 3072  }
 0x139   :  { %1232 = vsyncadd [#allocation3], 4294964224 }
 0x13a   :  { %1233 = dma.done.wait [#allocation5], 6144  }
 0x13b   :  { %1234 = vsyncadd [#allocation5], 4294961152 }
 0x13c   :  { %887 = vsyncpa [#allocation3], 1 }
 0x13d   :  { %888 = vsyncpa [#allocation5], 1 }

</bundles_post_ra>
